<compile_context>
chip_gen: v6e
topology: v6e:2x2x1
jax: 0.10.0
libtpu: 0.0.40
codegen_flags: <defaults>
</compile_context>

<pallas_src>
import functools

import jax
import jax.numpy as jnp
from jax.experimental import pallas as pl
from jax.experimental.pallas import tpu as pltpu


LANE = 128
MAX_TILE_M = 1024


def _round_up(x, m):
    return ((x + m - 1) // m) * m


def _leaky_relu(x, slope=0.2):
    return jnp.where(x > 0, x, slope * x)


def _mlp_kernel(x_ref, w1_ref, b1_ref, w2_ref, b2_ref, w3_ref, b3_ref, o_ref,
                *, apply_sigmoid):
    # Layer 1: Linear + LeakyReLU (f32 accumulation on the MXU)
    h1 = jnp.dot(x_ref[...], w1_ref[...], preferred_element_type=jnp.float32)
    h1 = _leaky_relu(h1 + b1_ref[...])
    # Dropout(0.2) -> identity in eval mode

    # Layer 2: Linear + LeakyReLU (feed MXU with compute dtype, accumulate f32)
    h2 = jnp.dot(h1.astype(w2_ref.dtype), w2_ref[...],
                 preferred_element_type=jnp.float32)
    h2 = _leaky_relu(h2 + b2_ref[...])
    # Dropout(0.2) -> identity in eval mode

    # Layer 3: Linear (+ optional final Sigmoid on the EUP)
    out = jnp.dot(h2.astype(w3_ref.dtype), w3_ref[...],
                  preferred_element_type=jnp.float32)
    out = out + b3_ref[...]
    if apply_sigmoid:
        out = 1.0 / (1.0 + jnp.exp(-out))
    o_ref[...] = out.astype(o_ref.dtype)


def _single_forward(x, params, *, apply_sigmoid, use_bf16=True):
    """Run the shared MLP on x: (rows, input_dim) -> (rows, out_dim); padding handled here."""
    total, input_dim = x.shape
    w1, b1 = params["W1"], params["b1"]
    w2, b2 = params["W2"], params["b2"]
    w3, b3 = params["W3"], params["b3"]
    h1_dim, h2_dim, out_dim = w1.shape[1], w2.shape[1], w3.shape[1]

    # Lane-pad every feature dimension to a multiple of 128 (zero padding is exact).
    k_pad = _round_up(input_dim, LANE)
    h1_pad = _round_up(h1_dim, LANE)
    h2_pad = _round_up(h2_dim, LANE)
    n_pad = _round_up(out_dim, LANE)   # lane-dense output (out_dim=1 -> 128)

    # Batch tiling: big tiles (up to MAX_TILE_M rows), cdiv grid + zero-padded batch.
    m_min = _round_up(max(total, 1), LANE)
    tile_m = min(MAX_TILE_M, m_min)
    num_tiles = pl.cdiv(m_min, tile_m)
    if num_tiles == 1 and m_min >= 2 * LANE and (m_min // 2) % LANE == 0:
        # Give the grid >=2 steps so ("parallel",) can use both v7x TensorCores.
        tile_m = m_min // 2
        num_tiles = 2
    m_pad = tile_m * num_tiles

    cdt = jnp.bfloat16 if use_bf16 else jnp.float32

    xp = jnp.zeros((m_pad, k_pad), cdt).at[:total, :input_dim].set(x.astype(cdt))
    w1p = jnp.zeros((k_pad, h1_pad), cdt).at[:input_dim, :h1_dim].set(w1.astype(cdt))
    w2p = jnp.zeros((h1_pad, h2_pad), cdt).at[:h1_dim, :h2_dim].set(w2.astype(cdt))
    w3p = jnp.zeros((h2_pad, n_pad), cdt).at[:h2_dim, :out_dim].set(w3.astype(cdt))
    # Biases stay f32: added to the f32 accumulator.
    b1p = jnp.zeros((1, h1_pad), jnp.float32).at[:, :h1_dim].set(b1.astype(jnp.float32))
    b2p = jnp.zeros((1, h2_pad), jnp.float32).at[:, :h2_dim].set(b2.astype(jnp.float32))
    b3p = jnp.zeros((1, n_pad), jnp.float32).at[:, :out_dim].set(b3.astype(jnp.float32))

    # Explicit VMEM budget (double-buffered x/out tiles + resident weights + biases),
    # with 2x headroom, clamped to stay inside v7x's 64 MiB physical VMEM.
    cbytes = 2 if use_bf16 else 4
    vmem_needed = (
        2 * tile_m * k_pad * cbytes                       # double-buffered x tile
        + 2 * tile_m * n_pad * 4                          # double-buffered out tile (f32)
        + 2 * (k_pad * h1_pad + h1_pad * h2_pad + h2_pad * n_pad) * cbytes  # weights
        + 2 * (h1_pad + h2_pad + n_pad) * 4               # biases
        + tile_m * max(h1_pad, h2_pad) * 4                # in-flight f32 activations
    )
    vmem_limit = int(min(max(2 * vmem_needed + (4 << 20), 8 << 20), 64 << 20))

    kernel = functools.partial(_mlp_kernel, apply_sigmoid=apply_sigmoid)

    out_full = pl.pallas_call(
        kernel,
        out_shape=jax.ShapeDtypeStruct((m_pad, n_pad), jnp.float32),
        grid_spec=pltpu.PrefetchScalarGridSpec(
            num_scalar_prefetch=0,
            grid=(num_tiles,),
            in_specs=[
                pl.BlockSpec((tile_m, k_pad), lambda i: (i, 0)),    # x tile
                # Weights/biases are tiny (<=128x128); constant index_map keeps them
                # resident across grid steps (no re-DMA).
                pl.BlockSpec((k_pad, h1_pad), lambda i: (0, 0)),    # W1
                pl.BlockSpec((1, h1_pad), lambda i: (0, 0)),        # b1
                pl.BlockSpec((h1_pad, h2_pad), lambda i: (0, 0)),   # W2
                pl.BlockSpec((1, h2_pad), lambda i: (0, 0)),        # b2
                pl.BlockSpec((h2_pad, n_pad), lambda i: (0, 0)),    # W3
                pl.BlockSpec((1, n_pad), lambda i: (0, 0)),         # b3
            ],
            out_specs=pl.BlockSpec((tile_m, n_pad), lambda i: (i, 0)),
        ),
        compiler_params=pltpu.CompilerParams(
            dimension_semantics=("parallel",),
            vmem_limit_bytes=vmem_limit,
        ),
    )(xp, w1p, b1p, w2p, b2p, w3p, b3p)

    return out_full[:total, :out_dim]


@functools.partial(jax.jit, static_argnames=("cost_function_v", "use_bf16"))
def combined_forward(x1, x2, params, *, cost_function_v=2, use_bf16=True):
    """CombinedArchitecture.forward: shared-weight MLP on both inputs + final activation."""
    apply_sigmoid = {2: True, 3: False, 5: True}[cost_function_v]
    n1 = x1.shape[0]
    # Shared weights -> fuse both branches into one kernel launch (bigger batch tile).
    x = jnp.concatenate([x1, x2], axis=0)
    out = _single_forward(x, params, apply_sigmoid=apply_sigmoid, use_bf16=use_bf16)
    return out[:n1], out[n1:]


def init_params(key, input_dim, output_dim):
    """nn.Linear-style init (uniform(-1/sqrt(fan_in), 1/sqrt(fan_in))), weights stored (in, out)."""
    def linear_init(k, fan_in, fan_out):
        kw, kb = jax.random.split(k)
        bound = 1.0 / float(fan_in) ** 0.5
        W = jax.random.uniform(kw, (fan_in, fan_out), jnp.float32, -bound, bound)
        b = jax.random.uniform(kb, (1, fan_out), jnp.float32, -bound, bound)
        return W, b

    k1, k2, k3 = jax.random.split(key, 3)
    W1, b1 = linear_init(k1, input_dim, 128)
    W2, b2 = linear_init(k2, 128, 64)
    W3, b3 = linear_init(k3, 64, output_dim)
    return {"W1": W1, "b1": b1, "W2": W2, "b2": b2, "W3": W3, "b3": b3}


def _reference_forward(x, params, *, apply_sigmoid, use_bf16):
    """Pure-JAX reference mimicking the kernel's dtype handling."""
    cdt = jnp.bfloat16 if use_bf16 else jnp.float32

    def c(a):  # cast operands exactly like the kernel does
        return a.astype(cdt).astype(jnp.float32)

    h = c(x) @ c(params["W1"]) + params["b1"]
    h = jnp.where(h > 0, h, 0.2 * h)
    h = c(h) @ c(params["W2"]) + params["b2"]
    h = jnp.where(h > 0, h, 0.2 * h)
    out = c(h) @ c(params["W3"]) + params["b3"]
    if apply_sigmoid:
        out = jax.nn.sigmoid(out)
    return out


if __name__ == "__main__":
    key = jax.random.PRNGKey(0)
    k_params, k_x1, k_x2 = jax.random.split(key, 3)

    batch, input_dim, output_dim = 16, 32, 1
    cost_function_v = 2  # -> Sigmoid final activation

    params = init_params(k_params, input_dim, output_dim)
    x1 = jax.random.normal(k_x1, (batch, input_dim), jnp.float32)
    x2 = jax.random.normal(k_x2, (batch, input_dim), jnp.float32)

    out1, out2 = combined_forward(x1, x2, params,
                                  cost_function_v=cost_function_v, use_bf16=True)
    out1 = jax.block_until_ready(out1)
    out2 = jax.block_until_ready(out2)

    ref1 = _reference_forward(x1, params, apply_sigmoid=True, use_bf16=True)
    ref2 = _reference_forward(x2, params, apply_sigmoid=True, use_bf16=True)

    assert out1.shape == (batch, output_dim) and out2.shape == (batch, output_dim)
    assert jnp.allclose(out1, ref1, atol=2e-3, rtol=2e-3)
    assert jnp.allclose(out2, ref2, atol=2e-3, rtol=2e-3)

    print("KERNEL_OK")
</pallas_src>

<mosaic_0001>
module attributes {stable_mosaic.version = 11 : i64} {
  func.func @_mlp_kernel(%arg0: i32, %arg1: memref<128x128xbf16, #tpu.memory_space<vmem>>, %arg2: memref<128x128xbf16, #tpu.memory_space<vmem>>, %arg3: memref<1x128xf32, #tpu.memory_space<vmem>>, %arg4: memref<128x128xbf16, #tpu.memory_space<vmem>>, %arg5: memref<1x128xf32, #tpu.memory_space<vmem>>, %arg6: memref<128x128xbf16, #tpu.memory_space<vmem>>, %arg7: memref<1x128xf32, #tpu.memory_space<vmem>>, %arg8: memref<128x128xf32, #tpu.memory_space<vmem>>) attributes {dimension_semantics = [#tpu.dimension_semantics<parallel>], iteration_bounds = array<i64: 1>, scalar_prefetch = 0 : i64, scratch_operands = 0 : i64, tpu.core_type = #tpu.core_type<tc>, window_params = [{transform_indices = @transform_0, window_bounds = array<i64: 128, 128>}, {pipeline_mode = #tpu.pipeline_mode<synchronous>, transform_indices = @transform_1, window_bounds = array<i64: 128, 128>}, {pipeline_mode = #tpu.pipeline_mode<synchronous>, transform_indices = @transform_2, window_bounds = array<i64: 1, 128>}, {pipeline_mode = #tpu.pipeline_mode<synchronous>, transform_indices = @transform_3, window_bounds = array<i64: 128, 128>}, {pipeline_mode = #tpu.pipeline_mode<synchronous>, transform_indices = @transform_4, window_bounds = array<i64: 1, 128>}, {pipeline_mode = #tpu.pipeline_mode<synchronous>, transform_indices = @transform_5, window_bounds = array<i64: 128, 128>}, {pipeline_mode = #tpu.pipeline_mode<synchronous>, transform_indices = @transform_6, window_bounds = array<i64: 1, 128>}, {transform_indices = @transform_7, window_bounds = array<i64: 128, 128>}]} {
    %c0 = arith.constant 0 : index
    %c0_0 = arith.constant 0 : index
    %0 = vector.load %arg1[%c0, %c0_0] : memref<128x128xbf16, #tpu.memory_space<vmem>>, vector<128x128xbf16>
    %c0_1 = arith.constant 0 : index
    %c0_2 = arith.constant 0 : index
    %1 = vector.load %arg2[%c0_1, %c0_2] : memref<128x128xbf16, #tpu.memory_space<vmem>>, vector<128x128xbf16>
    %cst = arith.constant dense<0.000000e+00> : vector<128x128xf32>
    %2 = tpu.matmul %0, %1, %cst {dimension_numbers = #tpu.dot_dimension_numbers<[1], [0], [0], [1], [0, 0, 1, 1], [], []>} : vector<128x128xbf16>, vector<128x128xbf16>, vector<128x128xf32> -> vector<128x128xf32>
    %c0_3 = arith.constant 0 : index
    %c0_4 = arith.constant 0 : index
    %3 = vector.load %arg3[%c0_3, %c0_4] : memref<1x128xf32, #tpu.memory_space<vmem>>, vector<1x128xf32>
    %4 = vector.broadcast %3 : vector<1x128xf32> to vector<128x128xf32>
    %5 = arith.addf %2, %4 : vector<128x128xf32>
    %cst_5 = arith.constant 0.000000e+00 : f32
    %6 = vector.broadcast %cst_5 : f32 to vector<128x128xf32>
    %7 = arith.cmpf ogt, %5, %6 : vector<128x128xf32>
    %cst_6 = arith.constant 2.000000e-01 : f32
    %8 = vector.broadcast %cst_6 : f32 to vector<128x128xf32>
    %9 = arith.mulf %8, %5 : vector<128x128xf32>
    %10 = arith.select %7, %5, %9 : vector<128x128xi1>, vector<128x128xf32>
    %11 = arith.truncf %10 : vector<128x128xf32> to vector<128x128xbf16>
    %c0_7 = arith.constant 0 : index
    %c0_8 = arith.constant 0 : index
    %12 = vector.load %arg4[%c0_7, %c0_8] : memref<128x128xbf16, #tpu.memory_space<vmem>>, vector<128x128xbf16>
    %cst_9 = arith.constant dense<0.000000e+00> : vector<128x128xf32>
    %13 = tpu.matmul %11, %12, %cst_9 {dimension_numbers = #tpu.dot_dimension_numbers<[1], [0], [0], [1], [0, 0, 1, 1], [], []>} : vector<128x128xbf16>, vector<128x128xbf16>, vector<128x128xf32> -> vector<128x128xf32>
    %c0_10 = arith.constant 0 : index
    %c0_11 = arith.constant 0 : index
    %14 = vector.load %arg5[%c0_10, %c0_11] : memref<1x128xf32, #tpu.memory_space<vmem>>, vector<1x128xf32>
    %15 = vector.broadcast %14 : vector<1x128xf32> to vector<128x128xf32>
    %16 = arith.addf %13, %15 : vector<128x128xf32>
    %cst_12 = arith.constant 0.000000e+00 : f32
    %17 = vector.broadcast %cst_12 : f32 to vector<128x128xf32>
    %18 = arith.cmpf ogt, %16, %17 : vector<128x128xf32>
    %cst_13 = arith.constant 2.000000e-01 : f32
    %19 = vector.broadcast %cst_13 : f32 to vector<128x128xf32>
    %20 = arith.mulf %19, %16 : vector<128x128xf32>
    %21 = arith.select %18, %16, %20 : vector<128x128xi1>, vector<128x128xf32>
    %22 = arith.truncf %21 : vector<128x128xf32> to vector<128x128xbf16>
    %c0_14 = arith.constant 0 : index
    %c0_15 = arith.constant 0 : index
    %23 = vector.load %arg6[%c0_14, %c0_15] : memref<128x128xbf16, #tpu.memory_space<vmem>>, vector<128x128xbf16>
    %cst_16 = arith.constant dense<0.000000e+00> : vector<128x128xf32>
    %24 = tpu.matmul %22, %23, %cst_16 {dimension_numbers = #tpu.dot_dimension_numbers<[1], [0], [0], [1], [0, 0, 1, 1], [], []>} : vector<128x128xbf16>, vector<128x128xbf16>, vector<128x128xf32> -> vector<128x128xf32>
    %c0_17 = arith.constant 0 : index
    %c0_18 = arith.constant 0 : index
    %25 = vector.load %arg7[%c0_17, %c0_18] : memref<1x128xf32, #tpu.memory_space<vmem>>, vector<1x128xf32>
    %26 = vector.broadcast %25 : vector<1x128xf32> to vector<128x128xf32>
    %27 = arith.addf %24, %26 : vector<128x128xf32>
    %cst_19 = arith.constant 0.000000e+00 : f32
    %28 = vector.broadcast %cst_19 : f32 to vector<128x128xf32>
    %29 = arith.subf %28, %27 : vector<128x128xf32>
    %30 = math.exp %29 : vector<128x128xf32>
    %cst_20 = arith.constant 1.000000e+00 : f32
    %31 = vector.broadcast %cst_20 : f32 to vector<128x128xf32>
    %32 = arith.addf %31, %30 : vector<128x128xf32>
    %cst_21 = arith.constant 1.000000e+00 : f32
    %33 = vector.broadcast %cst_21 : f32 to vector<128x128xf32>
    %34 = arith.divf %33, %32 : vector<128x128xf32>
    %c0_22 = arith.constant 0 : index
    %c0_23 = arith.constant 0 : index
    %35 = vector.load %arg8[%c0_22, %c0_23] : memref<128x128xf32, #tpu.memory_space<vmem>>, vector<128x128xf32>
    tpu.vector_store %arg8[%c0_22, %c0_23], %34 {strides = array<i32>} : memref<128x128xf32, #tpu.memory_space<vmem>>, vector<128x128xf32>,
    return
  }
  func.func @transform_0(%arg0: i32) -> (i32, i32) {
    %c0_i32 = arith.constant 0 : i32
    %c0_i32_0 = arith.constant 0 : i32
    return %arg0, %c0_i32 : i32, i32
  }
  func.func @transform_1(%arg0: i32) -> (i32, i32) {
    %c0_i32 = arith.constant 0 : i32
    %c0_i32_0 = arith.constant 0 : i32
    %c0_i32_1 = arith.constant 0 : i32
    return %c0_i32, %c0_i32_0 : i32, i32
  }
  func.func @transform_2(%arg0: i32) -> (i32, i32) {
    %c0_i32 = arith.constant 0 : i32
    %c0_i32_0 = arith.constant 0 : i32
    %c0_i32_1 = arith.constant 0 : i32
    return %c0_i32, %c0_i32_0 : i32, i32
  }
  func.func @transform_3(%arg0: i32) -> (i32, i32) {
    %c0_i32 = arith.constant 0 : i32
    %c0_i32_0 = arith.constant 0 : i32
    %c0_i32_1 = arith.constant 0 : i32
    return %c0_i32, %c0_i32_0 : i32, i32
  }
  func.func @transform_4(%arg0: i32) -> (i32, i32) {
    %c0_i32 = arith.constant 0 : i32
    %c0_i32_0 = arith.constant 0 : i32
    %c0_i32_1 = arith.constant 0 : i32
    return %c0_i32, %c0_i32_0 : i32, i32
  }
  func.func @transform_5(%arg0: i32) -> (i32, i32) {
    %c0_i32 = arith.constant 0 : i32
    %c0_i32_0 = arith.constant 0 : i32
    %c0_i32_1 = arith.constant 0 : i32
    return %c0_i32, %c0_i32_0 : i32, i32
  }
  func.func @transform_6(%arg0: i32) -> (i32, i32) {
    %c0_i32 = arith.constant 0 : i32
    %c0_i32_0 = arith.constant 0 : i32
    %c0_i32_1 = arith.constant 0 : i32
    return %c0_i32, %c0_i32_0 : i32, i32
  }
  func.func @transform_7(%arg0: i32) -> (i32, i32) {
    %c0_i32 = arith.constant 0 : i32
    %c0_i32_0 = arith.constant 0 : i32
    return %arg0, %c0_i32 : i32, i32
  }
}

</mosaic_0001>

<bundles_post_ra>
// kernel: combined_forward.1
= control target key start
LH: loop header
LB: loop body
LE: loop exit
PB: predicated region body
PF: predicated region fallthrough
CT: control target
= control target key end

     0   :  { %s1385_s1 = inlined_call_operand.vmem [shape: bf16[128,128], index: 1, kind: input, shape index: {}]   ;;  %s1386_s0 = inlined_call_operand.vmem [shape: bf16[128,128], index: 0, kind: input, shape index: {}]   ;;  %s1387_s3 = inlined_call_operand.vmem [shape: bf16[128,128], index: 3, kind: input, shape index: {}]   ;;  %s1388_s5 = inlined_call_operand.vmem [shape: bf16[128,128], index: 5, kind: input, shape index: {}]   ;;  %s1389_s2 = inlined_call_operand.vmem [shape: f32[1,128], index: 2, kind: input, shape index: {}]   ;;  %s1390_s4 = inlined_call_operand.vmem [shape: f32[1,128], index: 4, kind: input, shape index: {}]   ;;  %s1391_s6 = inlined_call_operand.vmem [shape: f32[1,128], index: 6, kind: input, shape index: {}]   ;;  %s1392_s7 = inlined_call_operand.vmem [shape: f32[128,128], index: 7, kind: output, shape index: {}]  }
   0x1   :  { %v1018_v0 = vld [vmem:[%s1385_s1 + $0x38] sm:$0xff]   ;;  %v1019_v1 = vld [vmem:[%s1385_s1 + $0x30] sm:$0xff]   ;;  %v1020_v2 = vld [vmem:[%s1385_s1 + $0x28] sm:$0xff]  }
   0x2   :  { %906 = vmatprep.subr.bf16.mxu0 %v1018_v0  ;;  %v1021_v3 = vld [vmem:[%s1385_s1 + $0x20] sm:$0xff]   ;;  %v1022_v5 = vld [vmem:[%s1385_s1 + $0x18] sm:$0xff]   ;;  %v1023_v6 = vld [vmem:[%s1385_s1 + $0x10] sm:$0xff]  }
   0x3   :  { %907 = vmatpush3.bf16.msra.mxu0 %v1018_v0  ;;  %v1026_v4 = vld [vmem:[%s1386_s0] sm:$0xff]   ;;  %v1034_v7 = vld [vmem:[%s1387_s3 + $0x38] sm:$0xff]   ;;  %v1035_v8 = vld [vmem:[%s1387_s3 + $0x30] sm:$0xff]  }
   0x4   :  { %908 = vmatprep.subr.bf16.mxu0 %v1019_v1  ;;  %922 = vmatprep.mubr.bf16.mxu0 %v1026_v4  ;;  %v1024_v9 = vld [vmem:[%s1385_s1 + $0x8] sm:$0xff]   ;;  %v1025_v11 = vld [vmem:[%s1385_s1] sm:$0xff]   ;;  %v1038_v13 = vld [vmem:[%s1387_s3 + $0x18] sm:$0xff]  }
   0x5   :  { %938 = vmatprep.subr.bf16.mxu1 %v1034_v7  ;;  %v1036_v10 = vld [vmem:[%s1387_s3 + $0x28] sm:$0xff]   ;;  %v1037_v12 = vld [vmem:[%s1387_s3 + $0x20] sm:$0xff]   ;;  %v1028_v15 = vld [vmem:[%s1386_s0 + $0x10] sm:$0xff]  }
   0x6   :  { %939 = vmatpush3.bf16.msra.mxu1 %v1034_v7  ;;  %v1027_v14 = vld [vmem:[%s1386_s0 + $0x8] sm:$0xff]   ;;  %v1029_v16 = vld [vmem:[%s1386_s0 + $0x18] sm:$0xff]   ;;  %v1030_v17 = vld [vmem:[%s1386_s0 + $0x20] sm:$0xff]  }
   0x7   :  { %909 = vmatpush3.bf16.msra.mxu0 %v1019_v1  ;;  %940 = vmatprep.subr.bf16.mxu1 %v1035_v8  ;;  %v1031_v18 = vld [vmem:[%s1386_s0 + $0x28] sm:$0xff]   ;;  %v1032_v19 = vld [vmem:[%s1386_s0 + $0x30] sm:$0xff]   ;;  %v1033_v20 = vld [vmem:[%s1386_s0 + $0x38] sm:$0xff]  }
   0x8   :  { %910 = vmatprep.subr.bf16.mxu0 %v1020_v2  ;;  %v1039_v21 = vld [vmem:[%s1387_s3 + $0x10] sm:$0xff]   ;;  %v1040_v22 = vld [vmem:[%s1387_s3 + $0x8] sm:$0xff]   ;;  %v1041_v23 = vld [vmem:[%s1387_s3] sm:$0xff]  }
   0x9   :  { %v1042_v24 = vld [vmem:[%s1388_s5 + $0x38] sm:$0xff]   ;;  %v1232_v25 = vld [vmem:[%s1388_s5 + $0x30] sm:$0xff]   ;;  %v1238_v26 = vld [vmem:[%s1388_s5 + $0x28] sm:$0xff]  }
   0xa   :  { %941 = vmatpush3.bf16.msra.mxu1 %v1035_v8  ;;  %v1245_v27 = vld [vmem:[%s1388_s5 + $0x20] sm:$0xff]   ;;  %v1252_v28 = vld [vmem:[%s1388_s5 + $0x18] sm:$0xff]  }
   0xb   :  { %911 = vmatpush3.bf16.msra.mxu0 %v1020_v2  ;;  %942 = vmatprep.subr.bf16.mxu1 %v1036_v10  ;;  %v1260_v30 = vld [vmem:[%s1389_s2] ss:$0 sm:$0xff] }
   0xc   :  { %912 = vmatprep.subr.bf16.mxu0 %v1021_v3 }
   0xe   :  { %943 = vmatpush3.bf16.msra.mxu1 %v1036_v10 }
   0xf   :  { %913 = vmatpush3.bf16.msra.mxu0 %v1021_v3  ;;  %944 = vmatprep.subr.bf16.mxu1 %v1037_v12 }
  0x10   :  { %914 = vmatprep.subr.bf16.mxu0 %v1022_v5 }
  0x12   :  { %945 = vmatpush3.bf16.msra.mxu1 %v1037_v12 }
  0x13   :  { %915 = vmatpush3.bf16.msra.mxu0 %v1022_v5  ;;  %946 = vmatprep.subr.bf16.mxu1 %v1038_v13 }
  0x14   :  { %916 = vmatprep.subr.bf16.mxu0 %v1023_v6 }
  0x16   :  { %947 = vmatpush3.bf16.msra.mxu1 %v1038_v13 }
  0x17   :  { %917 = vmatpush3.bf16.msra.mxu0 %v1023_v6  ;;  %948 = vmatprep.subr.bf16.mxu1 %v1039_v21 }
  0x18   :  { %918 = vmatprep.subr.bf16.mxu0 %v1024_v9 }
  0x1a   :  { %949 = vmatpush3.bf16.msra.mxu1 %v1039_v21 }
  0x1b   :  { %919 = vmatpush3.bf16.msra.mxu0 %v1024_v9  ;;  %950 = vmatprep.subr.bf16.mxu1 %v1040_v22 }
  0x1c   :  { %920 = vmatprep.subr.bf16.mxu0 %v1025_v11 }
  0x1e   :  { %951 = vmatpush3.bf16.msra.mxu1 %v1040_v22 }
  0x1f   :  { %921 = vmatpush3.bf16.msra.mxu0 %v1025_v11  ;;  %952 = vmatprep.subr.bf16.mxu1 %v1041_v23 }
  0x20   :  { %970 = vmatprep.subr.bf16.mxu0 %v1042_v24 }
  0x22   :  { %923 = vmatmul.mubr.bf16.vlgmr.msra.gmra.mxu0 %v1027_v14  ;;  %953 = vmatpush3.bf16.msra.mxu1 %v1041_v23 }
  0x23   :  { %926 = vmatprep.mubr.bf16.mxu0 %v1028_v15  ;;  %1002 = vmatprep.subr.bf16.mxu1 %v1042_v24 }
  0x24   :  { %971 = vmatpush3.bf16.msra.mxu0 %v1042_v24 }
  0x25   :  { %972 = vmatprep.subr.bf16.mxu0 %v1232_v25 }
  0x28   :  { %973 = vmatpush3.bf16.msra.mxu0 %v1232_v25 }
  0x29   :  { %974 = vmatprep.subr.bf16.mxu0 %v1238_v26 }
  0x2a   :  { %927 = vmatmul.mubr.bf16.gmra.mxu0 %v1029_v16 }
  0x2b   :  { %930 = vmatprep.mubr.bf16.mxu0 %v1030_v17 }
  0x2c   :  { %975 = vmatpush3.bf16.msra.mxu0 %v1238_v26 }
  0x2d   :  { %976 = vmatprep.subr.bf16.mxu0 %v1245_v27 }
  0x30   :  { %977 = vmatpush3.bf16.msra.mxu0 %v1245_v27 }
  0x31   :  { %978 = vmatprep.subr.bf16.mxu0 %v1252_v28 }
  0x32   :  { %931 = vmatmul.mubr.bf16.gmra.mxu0 %v1031_v18 }
  0x33   :  { %934 = vmatprep.mubr.bf16.mxu0 %v1032_v19 }
  0x34   :  { %979 = vmatpush3.bf16.msra.mxu0 %v1252_v28 }
  0x3a   :  { %935 = vmatmul.mubr.bf16.gmra.mxu0 %v1033_v20 }
  0xe2   :  { %v924_v29 = vpop.f32.mrf.mxu0 }
  0xe3   :  { %v205_v33 = vadd.f32 %v924_v29, %v1260_v30 }
  0xe4   :  { %v196_v31 = vpop.f32.mrf.mxu0 }
  0xe5   :  { %v197_v32 = vadd.f32 %v1260_v30, %v196_v31  ;;  %v277_v40 = vmul.f32 0.2, %v205_v33  ;;  %vm261_vm2 = vcmp.gt.f32.partialorder %v205_v33, 0.0 }
  0xe6   :  { %v925_v34 = vpop.f32.mrf.mxu0 }
  0xe7   :  { %v208_v35 = vadd.f32 %v925_v34, %v1260_v30  ;;  %v275_v37 = vmul.f32 0.2, %v197_v32  ;;  %vm259_vm1 = vcmp.gt.f32.partialorder %v197_v32, 0.0  ;;  %v293_v51 = vsel %vm261_vm2, %v205_v33, %v277_v40  ;;  %v1049_v40 = vld [vmem:[%s1388_s5] sm:$0xff]  }
  0xe8   :  { %v199_v36 = vpop.f32.mrf.mxu0 }
  0xe9   :  { %vm262_vm0 = vcmp.gt.f32.partialorder %v208_v35, 0.0  ;;  %v278_v38 = vmul.f32 0.2, %v208_v35  ;;  %v200_v39 = vadd.f32 %v1260_v30, %v199_v36  ;;  %v291_v46 = vsel %vm259_vm1, %v197_v32, %v275_v37 }
  0xea   :  { %v928_v41 = vpop.f32.mrf.mxu0 }
  0xeb   :  { %v276_v42 = vmul.f32 0.2, %v200_v39  ;;  %vm260_vm3 = vcmp.gt.f32.partialorder %v200_v39, 0.0  ;;  %v294_v44 = vsel %vm262_vm0, %v208_v35, %v278_v38  ;;  %v221_v48 = vadd.f32 %v928_v41, %v1260_v30 }
  0xec   :  { %v212_v43 = vpop.f32.mrf.mxu0  ;;  %v308_v53 = vpack.c.bf16 %v294_v44, %v293_v51 }
  0xed   :  { %v213_v45 = vadd.f32 %v1260_v30, %v212_v43  ;;  %v292_v47 = vsel %vm260_vm3, %v200_v39, %v276_v42  ;;  %v281_v58 = vmul.f32 0.2, %v221_v48  ;;  %vm265_vm6 = vcmp.gt.f32.partialorder %v221_v48, 0.0  ;;  %v1298_v42 = vld [vmem:[%s1390_s4] ss:$0 sm:$0xff] }
  0xee   :  { %v929_v49 = vpop.f32.mrf.mxu0  ;;  %v307_v50 = vpack.c.bf16 %v292_v47, %v291_v46 }
  0xef   :  { %v224_v52 = vadd.f32 %v929_v49, %v1260_v30  ;;  %v279_v55 = vmul.f32 0.2, %v213_v45  ;;  %vm263_vm5 = vcmp.gt.f32.partialorder %v213_v45, 0.0  ;;  %v297_v5 = vsel %vm265_vm6, %v221_v48, %v281_v58 }
  0xf0   :  { %v215_v54 = vpop.f32.mrf.mxu0  ;;  %954 = vmatprep.mubr.bf16.mxu1 %v307_v50 }
  0xf1   :  { %vm266_vm4 = vcmp.gt.f32.partialorder %v224_v52, 0.0  ;;  %v282_v56 = vmul.f32 0.2, %v224_v52  ;;  %v216_v57 = vadd.f32 %v1260_v30, %v215_v54  ;;  %955 = vmatmul.mubr.bf16.vlgmr.msra.gmra.mxu1 %v308_v53  ;;  %v295_v0 = vsel %vm263_vm5, %v213_v45, %v279_v55 }
  0xf2   :  { %v932_v59 = vpop.f32.mrf.mxu0  ;;  %1010 = vmatpush3.bf16.msra.mxu1 %v1042_v24 }
  0xf3   :  { %vm264_vm7 = vcmp.gt.f32.partialorder %v216_v57, 0.0  ;;  %v280_v60 = vmul.f32 0.2, %v216_v57  ;;  %1003 = vmatprep.subr.bf16.mxu1 %v1232_v25  ;;  %v298_v62 = vsel %vm266_vm4, %v224_v52, %v282_v56  ;;  %v237_v2 = vadd.f32 %v932_v59, %v1260_v30 }
  0xf4   :  { %v228_v61 = vpop.f32.mrf.mxu0  ;;  %v310_v7 = vpack.c.bf16 %v298_v62, %v297_v5 }
  0xf5   :  { %v229_v63 = vadd.f32 %v1260_v30, %v228_v61  ;;  %v296_v1 = vsel %vm264_vm7, %v216_v57, %v280_v60  ;;  %v285_v12 = vmul.f32 0.2, %v237_v2  ;;  %vm269_vm10 = vcmp.gt.f32.partialorder %v237_v2, 0.0 }
  0xf6   :  { %v933_v3 = vpop.f32.mrf.mxu0  ;;  %v309_v4 = vpack.c.bf16 %v296_v1, %v295_v0  ;;  %1011 = vmatpush3.bf16.msra.mxu1 %v1232_v25 }
  0xf7   :  { %v240_v6 = vadd.f32 %v933_v3, %v1260_v30  ;;  %1004 = vmatprep.subr.bf16.mxu1 %v1238_v26  ;;  %v283_v9 = vmul.f32 0.2, %v229_v63  ;;  %vm267_vm9 = vcmp.gt.f32.partialorder %v229_v63, 0.0  ;;  %v301_v23 = vsel %vm269_vm10, %v237_v2, %v285_v12 }
  0xf8   :  { %v231_v8 = vpop.f32.mrf.mxu0  ;;  %958 = vmatprep.mubr.bf16.mxu1 %v309_v4 }
  0xf9   :  { %vm270_vm8 = vcmp.gt.f32.partialorder %v240_v6, 0.0  ;;  %v286_v10 = vmul.f32 0.2, %v240_v6  ;;  %v232_v11 = vadd.f32 %v1260_v30, %v231_v8  ;;  %959 = vmatmul.mubr.bf16.gmra.mxu1 %v310_v7  ;;  %v299_v18 = vsel %vm267_vm9, %v229_v63, %v283_v9 }
  0xfa   :  { %v936_v13 = vpop.f32.mrf.mxu0  ;;  %1012 = vmatpush3.bf16.msra.mxu1 %v1238_v26 }
  0xfb   :  { %vm268_vm11 = vcmp.gt.f32.partialorder %v232_v11, 0.0  ;;  %v284_v14 = vmul.f32 0.2, %v232_v11  ;;  %1005 = vmatprep.subr.bf16.mxu1 %v1245_v27  ;;  %v302_v16 = vsel %vm270_vm8, %v240_v6, %v286_v10  ;;  %v253_v20 = vadd.f32 %v936_v13, %v1260_v30 }
  0xfc   :  { %v244_v15 = vpop.f32.mrf.mxu0  ;;  %v312_v25 = vpack.c.bf16 %v302_v16, %v301_v23 }
  0xfd   :  { %v245_v17 = vadd.f32 %v1260_v30, %v244_v15  ;;  %v300_v19 = vsel %vm268_vm11, %v232_v11, %v284_v14  ;;  %v289_v33 = vmul.f32 0.2, %v253_v20  ;;  %vm273_vm14 = vcmp.gt.f32.partialorder %v253_v20, 0.0 }
  0xfe   :  { %v937_v21 = vpop.f32.mrf.mxu0  ;;  %v311_v22 = vpack.c.bf16 %v300_v19, %v299_v18  ;;  %1013 = vmatpush3.bf16.msra.mxu1 %v1245_v27 }
  0xff   :  { %v256_v24 = vadd.f32 %v937_v21, %v1260_v30  ;;  %1006 = vmatprep.subr.bf16.mxu1 %v1252_v28  ;;  %v287_v29 = vmul.f32 0.2, %v245_v17  ;;  %vm271_vm13 = vcmp.gt.f32.partialorder %v245_v17, 0.0  ;;  %v305_v38 = vsel %vm273_vm14, %v253_v20, %v289_v33 }
 0x100   :  { %v247_v26 = vpop.f32.mrf.mxu0  ;;  %962 = vmatprep.mubr.bf16.mxu1 %v311_v22 }
 0x101   :  { %vm274_vm12 = vcmp.gt.f32.partialorder %v256_v24, 0.0  ;;  %v290_v31 = vmul.f32 0.2, %v256_v24  ;;  %v248_v32 = vadd.f32 %v1260_v30, %v247_v26  ;;  %963 = vmatmul.mubr.bf16.gmra.mxu1 %v312_v25  ;;  %v303_v35 = vsel %vm271_vm13, %v245_v17, %v287_v29  ;;  %v1047_v30 = vld [vmem:[%s1388_s5 + $0x10] sm:$0xff]  }
 0x102   :  { %1014 = vmatpush3.bf16.msra.mxu1 %v1252_v28  ;;  %980 = vmatprep.subr.bf16.mxu0 %v1047_v30  ;;  %v1048_v28 = vld [vmem:[%s1388_s5 + $0x8] sm:$0xff]  }
 0x103   :  { %vm272_vm15 = vcmp.gt.f32.partialorder %v248_v32, 0.0  ;;  %v288_v27 = vmul.f32 0.2, %v248_v32  ;;  %v306_v34 = vsel %vm274_vm12, %v256_v24, %v290_v31  ;;  %1007 = vmatprep.subr.bf16.mxu1 %v1047_v30  ;;  %981 = vmatpush3.bf16.msra.mxu0 %v1047_v30 }
 0x104   :  { %v314_v39 = vpack.c.bf16 %v306_v34, %v305_v38  ;;  %982 = vmatprep.subr.bf16.mxu0 %v1048_v28 }
 0x105   :  { %v304_v36 = vsel %vm272_vm15, %v248_v32, %v288_v27 }
 0x106   :  { %v313_v37 = vpack.c.bf16 %v304_v36, %v303_v35  ;;  %1015 = vmatpush3.bf16.msra.mxu1 %v1047_v30 }
 0x107   :  { %1008 = vmatprep.subr.bf16.mxu1 %v1048_v28  ;;  %983 = vmatpush3.bf16.msra.mxu0 %v1048_v28 }
 0x108   :  { %966 = vmatprep.mubr.bf16.mxu1 %v313_v37  ;;  %984 = vmatprep.subr.bf16.mxu0 %v1049_v40 }
 0x109   :  { %967 = vmatmul.mubr.bf16.gmra.mxu1 %v314_v39 }
 0x10a   :  { %1016 = vmatpush3.bf16.msra.mxu1 %v1048_v28 }
 0x10b   :  { %1009 = vmatprep.subr.bf16.mxu1 %v1049_v40  ;;  %985 = vmatpush3.bf16.msra.mxu0 %v1049_v40 }
 0x10e   :  { %1017 = vmatpush3.bf16.msra.mxu1 %v1049_v40 }
 0x1b1   :  { %v956_v41 = vpop.f32.mrf.mxu1 }
 0x1b2   :  { %v429_v45 = vadd.f32 %v956_v41, %v1298_v42 }
 0x1b3   :  { %v420_v43 = vpop.f32.mrf.mxu1 }
 0x1b4   :  { %v421_v44 = vadd.f32 %v1298_v42, %v420_v43  ;;  %v501_v52 = vmul.f32 0.2, %v429_v45  ;;  %vm485_vm2 = vcmp.gt.f32.partialorder %v429_v45, 0.0 }
 0x1b5   :  { %v957_v46 = vpop.f32.mrf.mxu1 }
 0x1b6   :  { %v432_v47 = vadd.f32 %v957_v46, %v1298_v42  ;;  %v499_v49 = vmul.f32 0.2, %v421_v44  ;;  %vm483_vm1 = vcmp.gt.f32.partialorder %v421_v44, 0.0  ;;  %v517_v60 = vsel %vm485_vm2, %v429_v45, %v501_v52 }
 0x1b7   :  { %v423_v48 = vpop.f32.mrf.mxu1 }
 0x1b8   :  { %vm486_vm0 = vcmp.gt.f32.partialorder %v432_v47, 0.0  ;;  %v502_v50 = vmul.f32 0.2, %v432_v47  ;;  %v424_v51 = vadd.f32 %v1298_v42, %v423_v48  ;;  %v515_v58 = vsel %vm483_vm1, %v421_v44, %v499_v49 }
 0x1b9   :  { %v960_v53 = vpop.f32.mrf.mxu1 }
 0x1ba   :  { %vm484_vm3 = vcmp.gt.f32.partialorder %v424_v51, 0.0  ;;  %v500_v54 = vmul.f32 0.2, %v424_v51  ;;  %v518_v55 = vsel %vm486_vm0, %v432_v47, %v502_v50  ;;  %v445_v61 = vadd.f32 %v960_v53, %v1298_v42 }
 0x1bb   :  { %v436_v56 = vpop.f32.mrf.mxu1  ;;  %v532_v0 = vpack.c.bf16 %v518_v55, %v517_v60 }
 0x1bc   :  { %v437_v57 = vadd.f32 %v1298_v42, %v436_v56  ;;  %v516_v59 = vsel %vm484_vm3, %v424_v51, %v500_v54  ;;  %v505_v6 = vmul.f32 0.2, %v445_v61  ;;  %vm489_vm6 = vcmp.gt.f32.partialorder %v445_v61, 0.0  ;;  %v1319_v51 = vld [vmem:[%s1391_s6] ss:$0 sm:$0xff] }
 0x1bd   :  { %v961_v62 = vpop.f32.mrf.mxu1  ;;  %v531_v63 = vpack.c.bf16 %v516_v59, %v515_v58 }
 0x1be   :  { %v448_v1 = vadd.f32 %v961_v62, %v1298_v42  ;;  %v503_v3 = vmul.f32 0.2, %v437_v57  ;;  %vm487_vm5 = vcmp.gt.f32.partialorder %v437_v57, 0.0  ;;  %v521_v17 = vsel %vm489_vm6, %v445_v61, %v505_v6 }
 0x1bf   :  { %v439_v2 = vpop.f32.mrf.mxu1  ;;  %986 = vmatprep.mubr.bf16.mxu0 %v531_v63 }
 0x1c0   :  { %vm490_vm4 = vcmp.gt.f32.partialorder %v448_v1, 0.0  ;;  %v506_v4 = vmul.f32 0.2, %v448_v1  ;;  %v440_v5 = vadd.f32 %v1298_v42, %v439_v2  ;;  %987 = vmatmul.mubr.bf16.vlgmr.msra.gmra.mxu0 %v532_v0  ;;  %v519_v12 = vsel %vm487_vm5, %v437_v57, %v503_v3 }
 0x1c1   :  { %v964_v7 = vpop.f32.mrf.mxu1 }
 0x1c2   :  { %vm488_vm7 = vcmp.gt.f32.partialorder %v440_v5, 0.0  ;;  %v504_v8 = vmul.f32 0.2, %v440_v5  ;;  %v522_v10 = vsel %vm490_vm4, %v448_v1, %v506_v4  ;;  %v461_v14 = vadd.f32 %v964_v7, %v1298_v42 }
 0x1c3   :  { %v452_v9 = vpop.f32.mrf.mxu1  ;;  %v534_v19 = vpack.c.bf16 %v522_v10, %v521_v17 }
 0x1c4   :  { %v453_v11 = vadd.f32 %v1298_v42, %v452_v9  ;;  %v520_v13 = vsel %vm488_vm7, %v440_v5, %v504_v8  ;;  %v509_v24 = vmul.f32 0.2, %v461_v14  ;;  %vm493_vm10 = vcmp.gt.f32.partialorder %v461_v14, 0.0 }
 0x1c5   :  { %v965_v15 = vpop.f32.mrf.mxu1  ;;  %v533_v16 = vpack.c.bf16 %v520_v13, %v519_v12 }
 0x1c6   :  { %v464_v18 = vadd.f32 %v965_v15, %v1298_v42  ;;  %v507_v21 = vmul.f32 0.2, %v453_v11  ;;  %vm491_vm9 = vcmp.gt.f32.partialorder %v453_v11, 0.0  ;;  %v525_v34 = vsel %vm493_vm10, %v461_v14, %v509_v24 }
 0x1c7   :  { %v455_v20 = vpop.f32.mrf.mxu1  ;;  %990 = vmatprep.mubr.bf16.mxu0 %v533_v16 }
 0x1c8   :  { %vm494_vm8 = vcmp.gt.f32.partialorder %v464_v18, 0.0  ;;  %v510_v22 = vmul.f32 0.2, %v464_v18  ;;  %v456_v23 = vadd.f32 %v1298_v42, %v455_v20  ;;  %991 = vmatmul.mubr.bf16.gmra.mxu0 %v534_v19  ;;  %v523_v33 = vsel %vm491_vm9, %v453_v11, %v507_v21 }
 0x1c9   :  { %v968_v25 = vpop.f32.mrf.mxu1 }
 0x1ca   :  { %vm492_vm11 = vcmp.gt.f32.partialorder %v456_v23, 0.0  ;;  %v508_v26 = vmul.f32 0.2, %v456_v23  ;;  %v526_v29 = vsel %vm494_vm8, %v464_v18, %v510_v22  ;;  %v477_v35 = vadd.f32 %v968_v25, %v1298_v42 }
 0x1cb   :  { %v468_v31 = vpop.f32.mrf.mxu1  ;;  %v536_v38 = vpack.c.bf16 %v526_v29, %v525_v34 }
 0x1cc   :  { %v469_v32 = vadd.f32 %v1298_v42, %v468_v31  ;;  %v524_v27 = vsel %vm492_vm11, %v456_v23, %v508_v26  ;;  %v513_v43 = vmul.f32 0.2, %v477_v35  ;;  %vm497_vm14 = vcmp.gt.f32.partialorder %v477_v35, 0.0 }
 0x1cd   :  { %v969_v36 = vpop.f32.mrf.mxu1  ;;  %v535_v37 = vpack.c.bf16 %v524_v27, %v523_v33 }
 0x1ce   :  { %v480_v39 = vadd.f32 %v969_v36, %v1298_v42  ;;  %v511_v28 = vmul.f32 0.2, %v469_v32  ;;  %vm495_vm13 = vcmp.gt.f32.partialorder %v469_v32, 0.0  ;;  %v529_v49 = vsel %vm497_vm14, %v477_v35, %v513_v43 }
 0x1cf   :  { %v471_v30 = vpop.f32.mrf.mxu1  ;;  %994 = vmatprep.mubr.bf16.mxu1 %v535_v37 }
 0x1d0   :  { %vm498_vm12 = vcmp.gt.f32.partialorder %v480_v39, 0.0  ;;  %v514_v40 = vmul.f32 0.2, %v480_v39  ;;  %v472_v41 = vadd.f32 %v1298_v42, %v471_v30  ;;  %995 = vmatmul.mubr.bf16.vlgmr.msra.gmra.mxu1 %v536_v38  ;;  %v527_v46 = vsel %vm495_vm13, %v469_v32, %v511_v28 }
 0x1d2   :  { %vm496_vm15 = vcmp.gt.f32.partialorder %v472_v41, 0.0  ;;  %v512_v44 = vmul.f32 0.2, %v472_v41  ;;  %v530_v45 = vsel %vm498_vm12, %v480_v39, %v514_v40 }
 0x1d3   :  { %v538_v50 = vpack.c.bf16 %v530_v45, %v529_v49 }
 0x1d4   :  { %v528_v47 = vsel %vm496_vm15, %v472_v41, %v512_v44 }
 0x1d5   :  { %v537_v48 = vpack.c.bf16 %v528_v47, %v527_v46 }
 0x1d7   :  { %998 = vmatprep.mubr.bf16.mxu1 %v537_v48 }
 0x1d8   :  { %999 = vmatmul.mubr.bf16.gmra.mxu1 %v538_v50 }
 0x280   :  { %v988_v42 = vpop.f32.mrf.mxu0 }
 0x281   :  { %v653_v52 = vadd.f32 %v988_v42, %v1319_v51 }
 0x282   :  { %v644_v53 = vpop.f32.mrf.mxu0 }
 0x283   :  { %v709_v54 = vsub.f32 0.0, %v653_v52  ;;  %v645_v55 = vadd.f32 %v1319_v51, %v644_v53 }
 0x284   :  { %v989_v56 = vpop.f32.mrf.mxu0 }
 0x285   :  { %v727_v57 = vmul.f32 1.442695, %v709_v54  ;;  %v707_v58 = vsub.f32 0.0, %v645_v55  ;;  %v656_v59 = vadd.f32 %v989_v56, %v1319_v51 }
 0x286   :  { %v647_v60 = vpop.f32.mrf.mxu0 }
 0x287   :  { %1050 = vpow2.f32 %v727_v57  ;;  %v723_v61 = vmul.f32 1.442695, %v707_v58  ;;  %v710_v62 = vsub.f32 0.0, %v656_v59  ;;  %v648_v63 = vadd.f32 %v1319_v51, %v647_v60 }
 0x288   :  { %v992_v0 = vpop.f32.mrf.mxu0 }
 0x289   :  { %1052 = vpow2.f32 %v723_v61  ;;  %v729_v1 = vmul.f32 1.442695, %v710_v62  ;;  %v708_v2 = vsub.f32 0.0, %v648_v63  ;;  %v669_v3 = vadd.f32 %v992_v0, %v1319_v51 }
 0x28a   :  { %v660_v4 = vpop.f32.mrf.mxu0 }
 0x28b   :  { %1054 = vpow2.f32 %v729_v1  ;;  %v725_v5 = vmul.f32 1.442695, %v708_v2  ;;  %v713_v6 = vsub.f32 0.0, %v669_v3  ;;  %v661_v7 = vadd.f32 %v1319_v51, %v660_v4 }
 0x28c   :  { %v993_v8 = vpop.f32.mrf.mxu0 }
 0x28d   :  { %1056 = vpow2.f32 %v725_v5  ;;  %v735_v9 = vmul.f32 1.442695, %v713_v6  ;;  %v711_v10 = vsub.f32 0.0, %v661_v7  ;;  %v672_v11 = vadd.f32 %v993_v8, %v1319_v51 }
 0x28e   :  { %v663_v12 = vpop.f32.mrf.mxu0 }
 0x28f   :  { %1058 = vpow2.f32 %v735_v9  ;;  %v731_v13 = vmul.f32 1.442695, %v711_v10  ;;  %v714_v14 = vsub.f32 0.0, %v672_v11  ;;  %v664_v15 = vadd.f32 %v1319_v51, %v663_v12 }
 0x290   :  { %v996_v16 = vpop.f32.mrf.mxu1 }
 0x291   :  { %1060 = vpow2.f32 %v731_v13  ;;  %v737_v17 = vmul.f32 1.442695, %v714_v14  ;;  %v712_v18 = vsub.f32 0.0, %v664_v15  ;;  %v685_v19 = vadd.f32 %v996_v16, %v1319_v51 }
 0x292   :  { %v676_v20 = vpop.f32.mrf.mxu1 }
 0x293   :  { %1062 = vpow2.f32 %v737_v17  ;;  %v733_v21 = vmul.f32 1.442695, %v712_v18  ;;  %v717_v22 = vsub.f32 0.0, %v685_v19  ;;  %v677_v23 = vadd.f32 %v1319_v51, %v676_v20 }
 0x294   :  { %v1051_v24 = vpop.eup %1050  ;;  %v997_v25 = vpop.f32.mrf.mxu1 }
 0x295   :  { %v757_v26 = vadd.f32 1.0, %v1051_v24  ;;  %1064 = vpow2.f32 %v733_v21  ;;  %v743_v29 = vmul.f32 1.442695, %v717_v22  ;;  %v715_v31 = vsub.f32 0.0, %v677_v23 }
 0x296   :  { %v1053_v32 = vpop.eup %1052  ;;  %v688_v33 = vadd.f32 %v997_v25, %v1319_v51  ;;  %v679_v27 = vpop.f32.mrf.mxu1 }
 0x297   :  { %1066 = vrcp.f32 %v757_v26  ;;  %v755_v34 = vadd.f32 1.0, %v1053_v32  ;;  %v739_v35 = vmul.f32 1.442695, %v715_v31  ;;  %v680_v36 = vadd.f32 %v1319_v51, %v679_v27 }
 0x298   :  { %v1055_v37 = vpop.eup %1054  ;;  %1068 = vpow2.f32 %v743_v29  ;;  %v718_v38 = vsub.f32 0.0, %v688_v33  ;;  %v1000_v39 = vpop.f32.mrf.mxu1 }
 0x299   :  { %1070 = vrcp.f32 %v755_v34  ;;  %v758_v30 = vadd.f32 1.0, %v1055_v37  ;;  %v716_v28 = vsub.f32 0.0, %v680_v36  ;;  %v701_v40 = vadd.f32 %v1000_v39, %v1319_v51 }
 0x29a   :  { %v1057_v41 = vpop.eup %1056  ;;  %1072 = vpow2.f32 %v739_v35  ;;  %v745_v43 = vmul.f32 1.442695, %v718_v38  ;;  %v692_v44 = vpop.f32.mrf.mxu1 }
 0x29b   :  { %1074 = vrcp.f32 %v758_v30  ;;  %v756_v45 = vadd.f32 1.0, %v1057_v41  ;;  %v741_v46 = vmul.f32 1.442695, %v716_v28  ;;  %v721_v47 = vsub.f32 0.0, %v701_v40 }
 0x29c   :  { %v1059_v48 = vpop.eup %1058  ;;  %1076 = vpow2.f32 %v745_v43  ;;  %v693_v49 = vadd.f32 %v1319_v51, %v692_v44  ;;  %v1001_v50 = vpop.f32.mrf.mxu1 }
 0x29d   :  { %1078 = vrcp.f32 %v756_v45  ;;  %v761_v42 = vadd.f32 1.0, %v1059_v48  ;;  %v751_v52 = vmul.f32 1.442695, %v721_v47  ;;  %v704_v53 = vadd.f32 %v1001_v50, %v1319_v51 }
 0x29e   :  { %v1061_v54 = vpop.eup %1060  ;;  %1080 = vpow2.f32 %v741_v46  ;;  %v719_v55 = vsub.f32 0.0, %v693_v49  ;;  %v695_v56 = vpop.f32.mrf.mxu1 }
 0x29f   :  { %1082 = vrcp.f32 %v761_v42  ;;  %v759_v57 = vadd.f32 1.0, %v1061_v54  ;;  %v722_v58 = vsub.f32 0.0, %v704_v53  ;;  %v696_v59 = vadd.f32 %v1319_v51, %v695_v56 }
 0x2a0   :  { %v1063_v60 = vpop.eup %1062  ;;  %1084 = vpow2.f32 %v751_v52  ;;  %v747_v61 = vmul.f32 1.442695, %v719_v55 }
 0x2a1   :  { %1086 = vrcp.f32 %v759_v57  ;;  %v762_v62 = vadd.f32 1.0, %v1063_v60  ;;  %v753_v63 = vmul.f32 1.442695, %v722_v58  ;;  %v720_v0 = vsub.f32 0.0, %v696_v59 }
 0x2a2   :  { %v1065_v1 = vpop.eup %1064  ;;  %1088 = vpow2.f32 %v747_v61 }
 0x2a3   :  { %1090 = vrcp.f32 %v762_v62  ;;  %v760_v2 = vadd.f32 1.0, %v1065_v1  ;;  %v749_v3 = vmul.f32 1.442695, %v720_v0 }
 0x2a4   :  { %v1067_v4 = vpop.eup %1066  ;;  %1092 = vpow2.f32 %v753_v63 }
 0x2a5   :  { %v1069_v5 = vpop.eup %1068  ;;  %805 = vst [vmem:[%s1392_s7 + $0x10] sm:$0xff] %v1067_v4  ;;  %1094 = vrcp.f32 %v760_v2 }
 0x2a6   :  { %v1071_v51 = vpop.eup %1070  ;;  %v765_v6 = vadd.f32 1.0, %v1069_v5  ;;  %1096 = vpow2.f32 %v749_v3 }
 0x2a7   :  { %v1073_v7 = vpop.eup %1072  ;;  %803 = vst [vmem:[%s1392_s7] sm:$0xff] %v1071_v51 }
 0x2a8   :  { %v1075_v8 = vpop.eup %1074  ;;  %1098 = vrcp.f32 %v765_v6  ;;  %v763_v9 = vadd.f32 1.0, %v1073_v7 }
 0x2a9   :  { %v1077_v10 = vpop.eup %1076  ;;  %806 = vst [vmem:[%s1392_s7 + $0x18] sm:$0xff] %v1075_v8 }
 0x2aa   :  { %v1079_v11 = vpop.eup %1078  ;;  %1100 = vrcp.f32 %v763_v9  ;;  %v766_v12 = vadd.f32 1.0, %v1077_v10 }
 0x2ab   :  { %v1081_v13 = vpop.eup %1080  ;;  %804 = vst [vmem:[%s1392_s7 + $0x8] sm:$0xff] %v1079_v11 }
 0x2ac   :  { %v1083_v14 = vpop.eup %1082  ;;  %1102 = vrcp.f32 %v766_v12  ;;  %v764_v15 = vadd.f32 1.0, %v1081_v13 }
 0x2ad   :  { %v1085_v16 = vpop.eup %1084  ;;  %809 = vst [vmem:[%s1392_s7 + $0x30] sm:$0xff] %v1083_v14 }
 0x2ae   :  { %v1087_v17 = vpop.eup %1086  ;;  %1104 = vrcp.f32 %v764_v15  ;;  %v769_v18 = vadd.f32 1.0, %v1085_v16 }
 0x2af   :  { %v1089_v19 = vpop.eup %1088  ;;  %807 = vst [vmem:[%s1392_s7 + $0x20] sm:$0xff] %v1087_v17 }
 0x2b0   :  { %v1091_v20 = vpop.eup %1090  ;;  %1106 = vrcp.f32 %v769_v18  ;;  %v767_v21 = vadd.f32 1.0, %v1089_v19 }
 0x2b1   :  { %v1093_v22 = vpop.eup %1092  ;;  %810 = vst [vmem:[%s1392_s7 + $0x38] sm:$0xff] %v1091_v20 }
 0x2b2   :  { %v1095_v23 = vpop.eup %1094  ;;  %1108 = vrcp.f32 %v767_v21  ;;  %v770_v24 = vadd.f32 1.0, %v1093_v22 }
 0x2b3   :  { %v1097_v25 = vpop.eup %1096  ;;  %808 = vst [vmem:[%s1392_s7 + $0x28] sm:$0xff] %v1095_v23 }
 0x2b4   :  { %1110 = vrcp.f32 %v770_v24  ;;  %v768_v26 = vadd.f32 1.0, %v1097_v25 }
 0x2b5   :  { %v1099_v29 = vpop.eup %1098 }
 0x2b6   :  { %813 = vst [vmem:[%s1392_s7 + $0x50] sm:$0xff] %v1099_v29  ;;  %1112 = vrcp.f32 %v768_v26 }
 0x2b7   :  { %v1101_v31 = vpop.eup %1100 }
 0x2b8   :  { %811 = vst [vmem:[%s1392_s7 + $0x40] sm:$0xff] %v1101_v31 }
 0x2b9   :  { %v1103_v32 = vpop.eup %1102 }
 0x2ba   :  { %814 = vst [vmem:[%s1392_s7 + $0x58] sm:$0xff] %v1103_v32 }
 0x2bb   :  { %v1105_v33 = vpop.eup %1104 }
 0x2bc   :  { %812 = vst [vmem:[%s1392_s7 + $0x48] sm:$0xff] %v1105_v33 }
 0x2bd   :  { %v1107_v27 = vpop.eup %1106 }
 0x2be   :  { %817 = vst [vmem:[%s1392_s7 + $0x70] sm:$0xff] %v1107_v27 }
 0x2bf   :  { %v1109_v34 = vpop.eup %1108 }
 0x2c0   :  { %815 = vst [vmem:[%s1392_s7 + $0x60] sm:$0xff] %v1109_v34 }
 0x2c1   :  { %v1111_v35 = vpop.eup %1110 }
 0x2c2   :  { %818 = vst [vmem:[%s1392_s7 + $0x78] sm:$0xff] %v1111_v35 }
 0x2c3   :  { %v1113_v36 = vpop.eup %1112 }
 0x2c4   :  { %816 = vst [vmem:[%s1392_s7 + $0x68] sm:$0xff] %v1113_v36 }

</bundles_post_ra>
